<compile_context>
chip_gen: v5e
topology: v5e:2x2
jax: 0.10.0
libtpu: 0.0.40
codegen_flags: <defaults>
</compile_context>

<pallas_src>
import jax
import jax.numpy as jnp
from jax.experimental import pallas as pl
from jax.experimental.pallas import tpu as pltpu


def _probe_kernel(x_ref, w_ref, b_ref, o_ref, acc_ref):
    # x_ref: (tile_m, tile_k)  w_ref: (1, tile_k)  b_ref: (1,) in SMEM
    # o_ref: (tile_m, 1)       acc_ref: (tile_m, 1) f32 scratch (resident over k)
    k = pl.program_id(1)

    @pl.when(k == 0)
    def _init():
        acc_ref[...] = jnp.zeros_like(acc_ref)

    x = x_ref[...].astype(jnp.float32)
    w = w_ref[...].astype(jnp.float32)  # (1, tile_k) broadcasts over rows
    acc_ref[...] += jnp.sum(x * w, axis=-1, keepdims=True)

    @pl.when(k == pl.num_programs(1) - 1)
    def _finalize():
        o_ref[...] = (acc_ref[...] + b_ref[0]).astype(o_ref.dtype)


def _round_up(a, b):
    return (a + b - 1) // b * b


def probe_forward(x, weight, bias):
    """x: (..., D); weight: (1, D); bias: (1,).  Returns logits of shape (...,)."""
    *lead, d = x.shape
    m = 1
    for s in lead:
        m *= s
    x2d = x.reshape(m, d)
    w2d = weight.reshape(1, d)
    b1 = bias.reshape(1).astype(jnp.float32)

    itemsize = jnp.dtype(x.dtype).itemsize

    # ---- generation-aware tile / VMEM budget selection ----------------------
    try:
        vmem_bytes = int(pltpu.get_tpu_info().vmem_capacity_bytes)
    except Exception:
        vmem_bytes = 64 << 20  # conservative fallback (v7x-sized)
    # Each x tile is double-buffered by the BlockSpec pipeline; keep a single
    # tile to <= ~1/8 of physical VMEM so 2x tiles + weight + output fit easily.
    x_tile_budget = max(vmem_bytes // 8, 1 << 20)

    # Reduction (D) tile: full D when small, else 128-lane-aligned chunks so the
    # working set stays bounded independent of activation_dim.
    max_tile_k = 2048
    if d <= max_tile_k:
        tile_k = d
        d_pad = d
    else:
        tile_k = max_tile_k
        d_pad = _round_up(d, tile_k)

    # Row (M) tile: as large as the budget allows (multiple of 8 sublanes),
    # capped at 512 so realistic M keeps many grid steps for megacore sharding.
    tile_m = x_tile_budget // max(tile_k * itemsize, 1)
    tile_m = (tile_m // 8) * 8
    tile_m = max(8, min(tile_m, 512, _round_up(max(m, 1), 8)))
    m_pad = _round_up(max(m, 1), tile_m)

    # Zero-pad: padded rows only produce (discarded) bias values; padded D
    # columns contribute 0 to the reduction.
    if (m_pad, d_pad) != (m, d):
        x2d = jnp.pad(x2d, ((0, m_pad - m), (0, d_pad - d)))
    if d_pad != d:
        w2d = jnp.pad(w2d, ((0, 0), (0, d_pad - d)))

    grid = (m_pad // tile_m, d_pad // tile_k)

    vmem_limit = int(min(max(vmem_bytes - (16 << 20), 32 << 20), 96 << 20))

    out = pl.pallas_call(
        _probe_kernel,
        out_shape=jax.ShapeDtypeStruct((m_pad, 1), x.dtype),
        grid_spec=pltpu.PrefetchScalarGridSpec(
            num_scalar_prefetch=0,
            grid=grid,
            in_specs=[
                pl.BlockSpec((tile_m, tile_k), lambda i, k: (i, k)),   # x tile
                pl.BlockSpec((1, tile_k), lambda i, k: (0, k)),        # weight slice
                pl.BlockSpec(memory_space=pltpu.MemorySpace.SMEM),     # bias scalar
            ],
            out_specs=pl.BlockSpec((tile_m, 1), lambda i, k: (i, 0)),
            scratch_shapes=[pltpu.VMEM((tile_m, 1), jnp.float32)],
        ),
        compiler_params=pltpu.CompilerParams(
            dimension_semantics=("parallel", "arbitrary"),
            vmem_limit_bytes=vmem_limit,
        ),
    )(x2d, w2d, b1)

    # Drop padded rows, squeeze the size-1 feature dim -> original leading dims.
    return out[:m, 0].reshape(*lead)


if __name__ == "__main__":
    key = jax.random.PRNGKey(0)
    k_x, k_w, k_b = jax.random.split(key, 3)

    batch, seq, activation_dim = 2, 8, 32   # x: (2, 8, 32) -> logits: (2, 8)

    # Deterministic parameter init mimicking nn.Linear's U(-1/sqrt(D), 1/sqrt(D))
    bound = 1.0 / (activation_dim ** 0.5)
    weight = jax.random.uniform(k_w, (1, activation_dim), jnp.float32, -bound, bound)
    bias = jax.random.uniform(k_b, (1,), jnp.float32, -bound, bound)

    x = jax.random.normal(k_x, (batch, seq, activation_dim), jnp.float32)

    logits = probe_forward(x, weight, bias)
    jax.block_until_ready(logits)

    # Reference check in plain JAX
    ref = (x @ weight.reshape(activation_dim, 1) + bias).squeeze(-1)
    assert logits.shape == (batch, seq)
    assert jnp.allclose(logits, ref, atol=1e-5, rtol=1e-5)

    print("KERNEL_OK")
</pallas_src>

<mosaic_0001>
module attributes {stable_mosaic.version = 11 : i64} {
  func.func @_probe_kernel(%arg0: i32, %arg1: i32, %arg2: memref<16x32xf32, #tpu.memory_space<vmem>>, %arg3: memref<1x32xf32, #tpu.memory_space<vmem>>, %arg4: memref<1xf32, #tpu.memory_space<smem>>, %arg5: memref<16x1xf32, #tpu.memory_space<vmem>>, %arg6: memref<16x1xf32, #tpu.memory_space<vmem>>) attributes {dimension_semantics = [#tpu.dimension_semantics<parallel>, #tpu.dimension_semantics<arbitrary>], iteration_bounds = array<i64: 1, 1>, scalar_prefetch = 0 : i64, scratch_operands = 1 : i64, tpu.core_type = #tpu.core_type<tc>, window_params = [{transform_indices = @transform_0, window_bounds = array<i64: 16, 32>}, {transform_indices = @transform_1, window_bounds = array<i64: 1, 32>}, {transform_indices = @transform_2, window_bounds = array<i64: 1>}, {transform_indices = @transform_3, window_bounds = array<i64: 16, 1>}]} {
    %c0_i32 = arith.constant 0 : i32
    %0 = arith.cmpi eq, %arg1, %c0_i32 : i32
    %1 = arith.extui %0 : i1 to i32
    %c0_i32_0 = arith.constant 0 : i32
    %2 = arith.cmpi ne, %1, %c0_i32_0 : i32
    scf.if %2 {
      %cst_10 = arith.constant 0.000000e+00 : f32
      %15 = vector.broadcast %cst_10 : f32 to vector<16x1xf32>
      %c0_11 = arith.constant 0 : index
      %c0_12 = arith.constant 0 : index
      %16 = vector.load %arg6[%c0_11, %c0_12] : memref<16x1xf32, #tpu.memory_space<vmem>>, vector<16x1xf32>
      tpu.vector_store %arg6[%c0_11, %c0_12], %15 {strides = array<i32>} : memref<16x1xf32, #tpu.memory_space<vmem>>, vector<16x1xf32>,
    } else {
    }
    %c0 = arith.constant 0 : index
    %c0_1 = arith.constant 0 : index
    %3 = vector.load %arg2[%c0, %c0_1] : memref<16x32xf32, #tpu.memory_space<vmem>>, vector<16x32xf32>
    %c0_2 = arith.constant 0 : index
    %c0_3 = arith.constant 0 : index
    %4 = vector.load %arg3[%c0_2, %c0_3] : memref<1x32xf32, #tpu.memory_space<vmem>>, vector<1x32xf32>
    %c0_4 = arith.constant 0 : index
    %c0_5 = arith.constant 0 : index
    %5 = vector.load %arg6[%c0_4, %c0_5] : memref<16x1xf32, #tpu.memory_space<vmem>>, vector<16x1xf32>
    %6 = vector.broadcast %4 : vector<1x32xf32> to vector<16x32xf32>
    %7 = arith.mulf %3, %6 : vector<16x32xf32>
    %cst = arith.constant dense<0.000000e+00> : vector<16xf32>
    %8 = vector.multi_reduction <add>, %7, %cst [1] : vector<16x32xf32> to vector<16xf32>
    %9 = vector.shape_cast %8 : vector<16xf32> to vector<16x1xf32>
    %10 = arith.addf %5, %9 : vector<16x1xf32>
    %c0_6 = arith.constant 0 : index
    %c0_7 = arith.constant 0 : index
    %11 = vector.load %arg6[%c0_6, %c0_7] : memref<16x1xf32, #tpu.memory_space<vmem>>, vector<16x1xf32>
    tpu.vector_store %arg6[%c0_6, %c0_7], %10 {strides = array<i32>} : memref<16x1xf32, #tpu.memory_space<vmem>>, vector<16x1xf32>,
    %c0_i32_8 = arith.constant 0 : i32
    %12 = arith.cmpi eq, %arg1, %c0_i32_8 : i32
    %13 = arith.extui %12 : i1 to i32
    %c0_i32_9 = arith.constant 0 : i32
    %14 = arith.cmpi ne, %13, %c0_i32_9 : i32
    scf.if %14 {
      %c0_10 = arith.constant 0 : index
      %c0_11 = arith.constant 0 : index
      %15 = vector.load %arg6[%c0_10, %c0_11] : memref<16x1xf32, #tpu.memory_space<vmem>>, vector<16x1xf32>
      %c0_12 = arith.constant 0 : index
      %16 = memref.load %arg4[%c0_12] : memref<1xf32, #tpu.memory_space<smem>>
      %17 = vector.broadcast %16 : f32 to vector<16x1xf32>
      %18 = arith.addf %15, %17 : vector<16x1xf32>
      %c0_13 = arith.constant 0 : index
      %c0_14 = arith.constant 0 : index
      %19 = vector.load %arg5[%c0_13, %c0_14] : memref<16x1xf32, #tpu.memory_space<vmem>>, vector<16x1xf32>
      tpu.vector_store %arg5[%c0_13, %c0_14], %18 {strides = array<i32>} : memref<16x1xf32, #tpu.memory_space<vmem>>, vector<16x1xf32>,
    } else {
    }
    return
  }
  func.func @transform_0(%arg0: i32, %arg1: i32) -> (i32, i32) {
    %c0_i32 = arith.constant 0 : i32
    return %arg0, %arg1 : i32, i32
  }
  func.func @transform_1(%arg0: i32, %arg1: i32) -> (i32, i32) {
    %c0_i32 = arith.constant 0 : i32
    %c0_i32_0 = arith.constant 0 : i32
    return %c0_i32, %arg1 : i32, i32
  }
  func.func @transform_2(%arg0: i32, %arg1: i32) -> i32 {
    %c0_i32 = arith.constant 0 : i32
    %c0_i32_0 = arith.constant 0 : i32
    return %c0_i32 : i32
  }
  func.func @transform_3(%arg0: i32, %arg1: i32) -> (i32, i32) {
    %c0_i32 = arith.constant 0 : i32
    %c0_i32_0 = arith.constant 0 : i32
    return %arg0, %c0_i32 : i32, i32
  }
}

</mosaic_0001>

<bundles_post_ra>
// kernel: tpu_custom_call.1
= control target key start
LH: loop header
LB: loop body
LE: loop exit
PB: predicated region body
PF: predicated region fallthrough
CT: control target
= control target key end

     0   :  { %9 = vsyncpa [#allocation5], 0  ;;  %s107_s15 = smov [#allocation4]   ;;  %s108_s17 = smov 128   ;;  %s152_s0 = inlined_call_operand.hbm [shape: f32[16,32], index: 0, kind: input, shape index: {}]   ;;  %s153_s1 = inlined_call_operand.vmem [shape: f32[1,32], index: 1, kind: input, shape index: {}]   ;;  %s154_s2 = inlined_call_operand.<no memory space> [shape: f32[1], index: 2, kind: input, shape index: {}]   ;;  %s155_s3 = inlined_call_operand.vmem [shape: f32[16,1], index: 3, kind: output, shape index: {}]  }
   0x1   :  { %s14_s14 = sshll.u32 %s152_s0, 4  ;;  %s16_s16 = sshll.u32 %s107_s15, 4  ;;  %s15_s14 = int_to_ptr.hbm [resolvable:$true] %s14_s14  ;;  %s17_s16 = int_to_ptr.vmem [resolvable:$true] %s16_s16 }
   0x2   :  { %s109_s18 = smov 8  }
   0x3   :  { %22 = dma.hbm_to_vmem [thread:$0]  %s15_s14, 256, %s17_s16, [#allocation5], %s108_s17, %s108_s17, %s109_s18  }
   0x4   :  { %105 = dma.done.wait [#allocation5], 256  }
   0x5   :  { %106 = vsyncadd [#allocation5], 4294967040  ;;  %vm35_vm0 = vcmask 7168   ;;  %v110_v0 = vmov 0.0   ;;  %v38_v1 = vld [vmem:[#allocation4] sm:$0xff]  ;;  %vm48_vm1 = vcmask 261120   ;;  %v66_v12 = vstv %s154_s2 }
   0x6   :  { %36 = vst.msk [vmem:[#allocation2] sm:$0xff] %vm35_vm0, %v110_v0  ;;  %v80_v2 = vld [vmem:[%s153_s1] ss:$0 sm:$0xff]  ;;  %v39_v4 = vld [vmem:[#allocation4 + $0x8] sm:$0xff] }
   0x7   :  { %37 = vst.msk [vmem:[#allocation2 + $0x8] sm:$0xff] %vm35_vm0, %v110_v0  ;;  %v46_v3 = vmul.f32 %v80_v2, %v38_v1  ;;  %v47_v6 = vmul.f32 %v80_v2, %v39_v4 }
   0x9   :  { %v49_v5 = vsel %vm48_vm1, %v46_v3, 0.0  ;;  %v52_v7 = vsel %vm48_vm1, %v47_v6, 0.0 }
   0xa   :  { %50 = vadd.xlane.f32.xlu0 %v49_v5 }
   0xd   :  { %v41_v8 = vld [vmem:[#allocation2] sm:$0xff] }
   0xe   :  { %v42_v11 = vld [vmem:[#allocation2 + $0x8] sm:$0xff] }
  0x12   :  { %53 = vadd.xlane.f32.xlu0 %v52_v7 }
  0x7d   :  { %v51_v9 = vpop.xlane.xlu0 %50 }
  0x7e   :  { %v55_v10 = vadd.f32 %v51_v9, %v41_v8 }
  0x80   :  { %58 = vst.msk [vmem:[#allocation2] sm:$0xff] %vm35_vm0, %v55_v10 }
  0x85   :  { %v54_v13 = vpop.xlane.xlu0 %53 }
  0x86   :  { %v56_v14 = vadd.f32 %v54_v13, %v42_v11 }
  0x87   :  { %v63_v15 = vld [vmem:[#allocation2] sm:$0xff] }
  0x88   :  { %v67_v16 = vadd.f32 %v66_v12, %v63_v15  ;;  %59 = vst.msk [vmem:[#allocation2 + $0x8] sm:$0xff] %vm35_vm0, %v56_v14 }
  0x8a   :  { %69 = vst.msk [vmem:[%s155_s3] sm:$0xff] %vm35_vm0, %v67_v16 }
  0x8f   :  { %v64_v17 = vld [vmem:[#allocation2 + $0x8] sm:$0xff] }
  0x90   :  { %v68_v18 = vadd.f32 %v66_v12, %v64_v17 }
  0x92   :  { %70 = vst.msk [vmem:[%s155_s3 + $0x8] sm:$0xff] %vm35_vm0, %v68_v18 }
  0x93   :  { %75 = vsyncpa [#allocation5], 1 }

</bundles_post_ra>
